<compile_context>
chip_gen: v7x
topology: tpu7x:2x2x1
jax: 0.10.0
libtpu: 0.0.40
codegen_flags: <defaults>
</compile_context>

<pallas_src>
import jax
import jax.numpy as jnp
import numpy as np
from jax import lax
from jax.experimental import pallas as pl
from jax.experimental.pallas import tpu as pltpu

_LANE = 128


def _round_up(x, m):
    return (x + m - 1) // m * m


# ------------------------------ Pallas kernel --------------------------------

def _private_fused_kernel(dom_ref, cols_ref, wc_ref, bc_ref, xf_ref, wl_ref,
                          bl_ref, pool_ref, lin_ref):
    """Fused Conv2d(3x3,s1,p1,bias) + LeakyReLU(0.001) + MaxPool2d(2) and nn.Linear.

      dom_ref : (1,) int32 SMEM   scalar-prefetch domain id (consumed by index_maps)
      cols_ref: (4*M, K)  bf16    im2col patches, 4 pooling phases stacked on rows
                                   M = B*(H//2)*(W//2), K = 9*Cin
      wc_ref  : (1, K, Np) bf16   conv weight for the selected domain (N zero-padded)
      bc_ref  : (1, 1, Np) f32    conv bias (zero-padded)
      xf_ref  : (B, F)    bf16    flattened original input (for nn.Linear)
      wl_ref  : (1, F, Nh) bf16   linear weight (un-padded, Nh = hidden)
      bl_ref  : (1, 1, Nh) f32    linear bias
      pool_ref: (M, Np)   f32     pooled conv output, rows ordered (b, i, j)
      lin_ref : (B, Nh)   f32     linear output
    """
    del dom_ref  # only used by the BlockSpec index_maps
    m = pool_ref.shape[0]

    # --- Conv: one MXU matmul covering all 4 pooling phases and the whole batch.
    z = jnp.dot(cols_ref[...], wc_ref[0],
                preferred_element_type=jnp.float32)              # (4*M, Np) f32

    # --- MaxPool2d(2): max over the 4 contiguous (tile-aligned) row groups.
    y = jnp.maximum(jnp.maximum(z[0:m], z[m:2 * m]),
                    jnp.maximum(z[2 * m:3 * m], z[3 * m:4 * m]))

    # --- Bias + LeakyReLU(0.001) applied once after the max (exact: monotone
    #     activation, per-channel phase-invariant bias).  All f32 (v5e friendly).
    y = y + bc_ref[0]
    pool_ref[...] = jnp.where(y > 0, y, 0.001 * y).astype(pool_ref.dtype)

    # --- nn.Linear on the flattened original input (see TODO in private_apply).
    lz = jnp.dot(xf_ref[...], wl_ref[0],
                 preferred_element_type=jnp.float32) + bl_ref[0]
    lin_ref[...] = lz.astype(lin_ref.dtype)


# -------------------------------- JAX glue ------------------------------------

def _im2col_phases(x_nchw):
    """(B,C,H,W) f32 -> (4*B*(H//2)*(W//2), 9*C) bf16, pooling-phase-major rows."""
    B, C, H, W = x_nchw.shape
    x = jnp.transpose(x_nchw, (0, 2, 3, 1)).astype(jnp.bfloat16)  # NHWC, bf16 early
    xp = jnp.pad(x, ((0, 0), (1, 1), (1, 1), (0, 0)))             # conv padding = 1
    taps = [xp[:, kh:kh + H, kw:kw + W, :]
            for kh in range(3) for kw in range(3)]                # 9 shifted views
    patches = jnp.concatenate(taps, axis=-1)                      # (B,H,W,9C)
    Hp, Wp = H // 2, W // 2
    patches = patches.reshape(B, Hp, 2, Wp, 2, 9 * C)
    patches = jnp.transpose(patches, (2, 4, 0, 1, 3, 5))          # (dy,dx,B,Hp,Wp,9C)
    return patches.reshape(4 * B * Hp * Wp, 9 * C)


@jax.jit
def _private_pipeline(domain_id, x_p, wc, bc, wl, bl):
    """Fused per-domain pipeline.  Returns kernel outputs in native layout:
       pool (M, Np) f32 (channels 0..hidden-1 valid, rest zero), lin (B, hidden) f32."""
    B, C, H, W = x_p.shape
    _, K, Np = wc.shape
    F, hidden = wl.shape[1], wl.shape[2]
    Hp, Wp = H // 2, W // 2
    M = B * Hp * Wp

    dom = jnp.full((1,), domain_id, dtype=jnp.int32)              # scalar prefetch
    cols = _im2col_phases(x_p)                                    # (4*M, K) bf16
    xf = x_p.reshape(B, F).astype(jnp.bfloat16)

    pool, lin = pl.pallas_call(
        _private_fused_kernel,
        out_shape=(jax.ShapeDtypeStruct((M, Np), jnp.float32),
                   jax.ShapeDtypeStruct((B, hidden), jnp.float32)),
        grid_spec=pltpu.PrefetchScalarGridSpec(
            num_scalar_prefetch=1,
            grid=(1,),
            in_specs=[
                pl.BlockSpec((4 * M, K), lambda i, d: (0, 0)),
                pl.BlockSpec((1, K, Np), lambda i, d: (d[0], 0, 0)),
                pl.BlockSpec((1, 1, Np), lambda i, d: (d[0], 0, 0)),
                pl.BlockSpec((B, F), lambda i, d: (0, 0)),
                pl.BlockSpec((1, F, hidden), lambda i, d: (d[0], 0, 0)),
                pl.BlockSpec((1, 1, hidden), lambda i, d: (d[0], 0, 0)),
            ],
            out_specs=[
                pl.BlockSpec((M, Np), lambda i, d: (0, 0)),
                pl.BlockSpec((B, hidden), lambda i, d: (0, 0)),
            ],
        ),
        compiler_params=pltpu.CompilerParams(dimension_semantics=("arbitrary",)),
    )(dom, cols, wc, bc, xf, wl, bl)
    return pool, lin


# --------------------------- `Private` module port -----------------------------

def init_private_params(key, num_domains, C, H, W, hidden):
    """Raw (f32, PyTorch-layout) synthetic parameters, one set per domain."""
    k0, k1, k2, k3 = jax.random.split(key, 4)
    return dict(
        conv_w=0.1 * jax.random.normal(k0, (num_domains, 3, 3, C, hidden), jnp.float32),
        conv_b=0.1 * jax.random.normal(k1, (num_domains, hidden), jnp.float32),
        lin_w=0.05 * jax.random.normal(k2, (num_domains, C * H * W, hidden), jnp.float32),
        lin_b=0.05 * jax.random.normal(k3, (num_domains, hidden), jnp.float32),
    )


def pack_private_params(raw):
    """One-time packing into MXU-ready layout (no per-call pads / casts)."""
    D, _, _, C, hidden = raw["conv_w"].shape
    K = 9 * C
    Np = _round_up(hidden, _LANE)
    wc = raw["conv_w"].reshape(D, K, hidden)                       # (kh,kw,c)-major K
    wc = jnp.pad(wc, ((0, 0), (0, 0), (0, Np - hidden))).astype(jnp.bfloat16)
    bc = jnp.pad(raw["conv_b"][:, None, :],
                 ((0, 0), (0, 0), (0, Np - hidden))).astype(jnp.float32)
    wl = raw["lin_w"].astype(jnp.bfloat16)                         # (D, F, hidden)
    bl = raw["lin_b"][:, None, :].astype(jnp.float32)              # (D, 1, hidden)
    return dict(conv_w=wc, conv_b=bc, lin_w=wl, lin_b=bl)


def private_apply(packed, x_p, domain_id):
    """Runs the per-domain pipeline; returns (pool (M,128) f32, lin (B,hidden) f32)."""
    # TODO(synk): as written, the PyTorch Sequential feeds the (B,hidden,H/2,W/2)
    # maxpool output directly into nn.Linear(nchannel*size1*size2, hidden), which is
    # shape-incompatible and would raise at runtime. Its in_features only match the
    # flattened *original* input, so the Linear is applied to flatten(x_p).
    return _private_pipeline(domain_id, x_p,
                             packed["conv_w"], packed["conv_b"],
                             packed["lin_w"], packed["lin_b"])


def private_forward(packed, x_p, domain_id):
    """Exact analogue of Private.forward: runs the pipeline and returns None."""
    _ = private_apply(packed, x_p, domain_id)
    return None


# --------------------------------- reference -----------------------------------

def _reference_conv_pool_nhwc(x_nchw, w_hwio, b):
    y = lax.conv_general_dilated(
        x_nchw, jnp.transpose(w_hwio, (3, 2, 0, 1)),
        window_strides=(1, 1), padding=((1, 1), (1, 1)),
        dimension_numbers=("NCHW", "OIHW", "NCHW"))
    y = y + b.reshape(1, -1, 1, 1)
    y = jnp.where(y > 0, y, 0.001 * y)
    B, Cc, H, W = y.shape
    y = y.reshape(B, Cc, H // 2, 2, W // 2, 2).max(axis=(3, 5))    # (B,Cout,Hp,Wp)
    return jnp.transpose(y, (0, 2, 3, 1))                          # NHWC


# ----------------------------------- main ---------------------------------------

if __name__ == "__main__":
    key = jax.random.PRNGKey(0)
    B, C, H, W = 2, 4, 16, 16          # args.input_size = (4, 16, 16)
    hidden = 32                         # args.hidden_size
    num_domains = 3                     # args.num_domains
    domain_id = 1

    kx, kp = jax.random.split(key)
    x_p = jax.random.normal(kx, (B, C, H, W), jnp.float32)
    raw = init_private_params(kp, num_domains, C, H, W, hidden)
    packed = pack_private_params(raw)

    pool_flat, lin = private_apply(packed, x_p, domain_id)
    jax.block_until_ready((pool_flat, lin))

    # Host-side unpacking (test only — the hot path returns the flat padded layout).
    Hp, Wp = H // 2, W // 2
    pooled = np.asarray(pool_flat)[:, :hidden].reshape(B, Hp, Wp, hidden)
    ref_pool = np.asarray(_reference_conv_pool_nhwc(
        x_p, raw["conv_w"][domain_id], raw["conv_b"][domain_id]))
    ref_lin = np.asarray(x_p.reshape(B, -1) @ raw["lin_w"][domain_id]
                         + raw["lin_b"][domain_id])

    assert pool_flat.shape == (B * Hp * Wp, _round_up(hidden, _LANE))
    assert lin.shape == (B, hidden)
    assert np.allclose(pooled, ref_pool, rtol=2e-2, atol=2e-2)
    assert np.allclose(np.asarray(lin), ref_lin, rtol=2e-2, atol=2e-2)

    # Private.forward discards its result and returns None — mirror that exactly.
    assert private_forward(packed, x_p, domain_id) is None

    print("KERNEL_OK")
</pallas_src>

<mosaic_0001>
module attributes {stable_mosaic.version = 11 : i64} {
  func.func @_private_fused_kernel(%arg0: i32, %arg1: memref<1xi32, #tpu.memory_space<smem>>, %arg2: memref<512x36xbf16, #tpu.memory_space<vmem>>, %arg3: memref<1x36x128xbf16, #tpu.memory_space<vmem>>, %arg4: memref<1x1x128xf32, #tpu.memory_space<vmem>>, %arg5: memref<2x1024xbf16, #tpu.memory_space<vmem>>, %arg6: memref<1x1024x32xbf16, #tpu.memory_space<vmem>>, %arg7: memref<1x1x32xf32, #tpu.memory_space<vmem>>, %arg8: memref<128x128xf32, #tpu.memory_space<vmem>>, %arg9: memref<2x32xf32, #tpu.memory_space<vmem>>) attributes {dimension_semantics = [#tpu.dimension_semantics<arbitrary>], iteration_bounds = array<i64: 1>, scalar_prefetch = 1 : i64, scratch_operands = 0 : i64, tpu.core_type = #tpu.core_type<tc>, window_params = [{pipeline_mode = #tpu.pipeline_mode<synchronous>, transform_indices = @transform_0, window_bounds = array<i64: 512, 36>}, {transform_indices = @transform_1, window_bounds = array<i64: 1, 36, 128>}, {transform_indices = @transform_2, window_bounds = array<i64: 1, 1, 128>}, {pipeline_mode = #tpu.pipeline_mode<synchronous>, transform_indices = @transform_3, window_bounds = array<i64: 2, 1024>}, {transform_indices = @transform_4, window_bounds = array<i64: 1, 1024, 32>}, {transform_indices = @transform_5, window_bounds = array<i64: 1, 1, 32>}, {pipeline_mode = #tpu.pipeline_mode<synchronous>, transform_indices = @transform_6, window_bounds = array<i64: 128, 128>}, {pipeline_mode = #tpu.pipeline_mode<synchronous>, transform_indices = @transform_7, window_bounds = array<i64: 2, 32>}]} {
    %c0 = arith.constant 0 : index
    %c0_0 = arith.constant 0 : index
    %0 = vector.load %arg2[%c0, %c0_0] : memref<512x36xbf16, #tpu.memory_space<vmem>>, vector<512x36xbf16>
    %c0_1 = arith.constant 0 : index
    %c0_2 = arith.constant 0 : index
    %c0_3 = arith.constant 0 : index
    %1 = vector.load %arg3[%c0_1, %c0_2, %c0_3] : memref<1x36x128xbf16, #tpu.memory_space<vmem>>, vector<1x36x128xbf16>
    %2 = vector.shape_cast %1 : vector<1x36x128xbf16> to vector<36x128xbf16>
    %cst = arith.constant dense<0.000000e+00> : vector<512x128xf32>
    %3 = tpu.matmul %0, %2, %cst {dimension_numbers = #tpu.dot_dimension_numbers<[1], [0], [0], [1], [0, 0, 1, 1], [], []>} : vector<512x36xbf16>, vector<36x128xbf16>, vector<512x128xf32> -> vector<512x128xf32>
    %4 = vector.extract_strided_slice %3 {offsets = [0, 0], sizes = [128, 128], strides = [1, 1]} : vector<512x128xf32> to vector<128x128xf32>
    %5 = vector.extract_strided_slice %3 {offsets = [128, 0], sizes = [128, 128], strides = [1, 1]} : vector<512x128xf32> to vector<128x128xf32>
    %6 = arith.maximumf %4, %5 : vector<128x128xf32>
    %7 = vector.extract_strided_slice %3 {offsets = [256, 0], sizes = [128, 128], strides = [1, 1]} : vector<512x128xf32> to vector<128x128xf32>
    %8 = vector.extract_strided_slice %3 {offsets = [384, 0], sizes = [128, 128], strides = [1, 1]} : vector<512x128xf32> to vector<128x128xf32>
    %9 = arith.maximumf %7, %8 : vector<128x128xf32>
    %10 = arith.maximumf %6, %9 : vector<128x128xf32>
    %c0_4 = arith.constant 0 : index
    %c0_5 = arith.constant 0 : index
    %c0_6 = arith.constant 0 : index
    %11 = vector.load %arg4[%c0_4, %c0_5, %c0_6] : memref<1x1x128xf32, #tpu.memory_space<vmem>>, vector<1x1x128xf32>
    %12 = vector.shape_cast %11 : vector<1x1x128xf32> to vector<1x128xf32>
    %13 = vector.broadcast %12 : vector<1x128xf32> to vector<128x128xf32>
    %14 = arith.addf %10, %13 : vector<128x128xf32>
    %cst_7 = arith.constant 0.000000e+00 : f32
    %15 = vector.broadcast %cst_7 : f32 to vector<128x128xf32>
    %16 = arith.cmpf ogt, %14, %15 : vector<128x128xf32>
    %cst_8 = arith.constant 1.000000e-03 : f32
    %17 = vector.broadcast %cst_8 : f32 to vector<128x128xf32>
    %18 = arith.mulf %17, %14 : vector<128x128xf32>
    %19 = arith.select %16, %14, %18 : vector<128x128xi1>, vector<128x128xf32>
    %c0_9 = arith.constant 0 : index
    %c0_10 = arith.constant 0 : index
    %20 = vector.load %arg8[%c0_9, %c0_10] : memref<128x128xf32, #tpu.memory_space<vmem>>, vector<128x128xf32>
    tpu.vector_store %arg8[%c0_9, %c0_10], %19 {strides = array<i32>} : memref<128x128xf32, #tpu.memory_space<vmem>>, vector<128x128xf32>,
    %c0_11 = arith.constant 0 : index
    %c0_12 = arith.constant 0 : index
    %21 = vector.load %arg5[%c0_11, %c0_12] : memref<2x1024xbf16, #tpu.memory_space<vmem>>, vector<2x1024xbf16>
    %c0_13 = arith.constant 0 : index
    %c0_14 = arith.constant 0 : index
    %c0_15 = arith.constant 0 : index
    %22 = vector.load %arg6[%c0_13, %c0_14, %c0_15] : memref<1x1024x32xbf16, #tpu.memory_space<vmem>>, vector<1x1024x32xbf16>
    %23 = vector.shape_cast %22 : vector<1x1024x32xbf16> to vector<1024x32xbf16>
    %cst_16 = arith.constant dense<0.000000e+00> : vector<2x32xf32>
    %24 = tpu.matmul %21, %23, %cst_16 {dimension_numbers = #tpu.dot_dimension_numbers<[1], [0], [0], [1], [0, 0, 1, 1], [], []>} : vector<2x1024xbf16>, vector<1024x32xbf16>, vector<2x32xf32> -> vector<2x32xf32>
    %c0_17 = arith.constant 0 : index
    %c0_18 = arith.constant 0 : index
    %c0_19 = arith.constant 0 : index
    %25 = vector.load %arg7[%c0_17, %c0_18, %c0_19] : memref<1x1x32xf32, #tpu.memory_space<vmem>>, vector<1x1x32xf32>
    %26 = vector.shape_cast %25 : vector<1x1x32xf32> to vector<1x32xf32>
    %27 = vector.broadcast %26 : vector<1x32xf32> to vector<2x32xf32>
    %28 = arith.addf %24, %27 : vector<2x32xf32>
    %c0_20 = arith.constant 0 : index
    %c0_21 = arith.constant 0 : index
    %29 = vector.load %arg9[%c0_20, %c0_21] : memref<2x32xf32, #tpu.memory_space<vmem>>, vector<2x32xf32>
    tpu.vector_store %arg9[%c0_20, %c0_21], %28 {strides = array<i32>} : memref<2x32xf32, #tpu.memory_space<vmem>>, vector<2x32xf32>,
    return
  }
  func.func @transform_0(%arg0: i32, %arg1: memref<1xi32, #tpu.memory_space<smem>>) -> (i32, i32) {
    %c0_i32 = arith.constant 0 : i32
    %c0_i32_0 = arith.constant 0 : i32
    %c0_i32_1 = arith.constant 0 : i32
    return %c0_i32, %c0_i32_0 : i32, i32
  }
  func.func @transform_1(%arg0: i32, %arg1: memref<1xi32, #tpu.memory_space<smem>>) -> (i32, i32, i32) {
    %c0 = arith.constant 0 : index
    %0 = memref.load %arg1[%c0] : memref<1xi32, #tpu.memory_space<smem>>
    %c0_i32 = arith.constant 0 : i32
    %c0_i32_0 = arith.constant 0 : i32
    %c0_i32_1 = arith.constant 0 : i32
    return %0, %c0_i32, %c0_i32_0 : i32, i32, i32
  }
  func.func @transform_2(%arg0: i32, %arg1: memref<1xi32, #tpu.memory_space<smem>>) -> (i32, i32, i32) {
    %c0 = arith.constant 0 : index
    %0 = memref.load %arg1[%c0] : memref<1xi32, #tpu.memory_space<smem>>
    %c0_i32 = arith.constant 0 : i32
    %c0_i32_0 = arith.constant 0 : i32
    %c0_i32_1 = arith.constant 0 : i32
    return %0, %c0_i32, %c0_i32_0 : i32, i32, i32
  }
  func.func @transform_3(%arg0: i32, %arg1: memref<1xi32, #tpu.memory_space<smem>>) -> (i32, i32) {
    %c0_i32 = arith.constant 0 : i32
    %c0_i32_0 = arith.constant 0 : i32
    %c0_i32_1 = arith.constant 0 : i32
    return %c0_i32, %c0_i32_0 : i32, i32
  }
  func.func @transform_4(%arg0: i32, %arg1: memref<1xi32, #tpu.memory_space<smem>>) -> (i32, i32, i32) {
    %c0 = arith.constant 0 : index
    %0 = memref.load %arg1[%c0] : memref<1xi32, #tpu.memory_space<smem>>
    %c0_i32 = arith.constant 0 : i32
    %c0_i32_0 = arith.constant 0 : i32
    %c0_i32_1 = arith.constant 0 : i32
    return %0, %c0_i32, %c0_i32_0 : i32, i32, i32
  }
  func.func @transform_5(%arg0: i32, %arg1: memref<1xi32, #tpu.memory_space<smem>>) -> (i32, i32, i32) {
    %c0 = arith.constant 0 : index
    %0 = memref.load %arg1[%c0] : memref<1xi32, #tpu.memory_space<smem>>
    %c0_i32 = arith.constant 0 : i32
    %c0_i32_0 = arith.constant 0 : i32
    %c0_i32_1 = arith.constant 0 : i32
    return %0, %c0_i32, %c0_i32_0 : i32, i32, i32
  }
  func.func @transform_6(%arg0: i32, %arg1: memref<1xi32, #tpu.memory_space<smem>>) -> (i32, i32) {
    %c0_i32 = arith.constant 0 : i32
    %c0_i32_0 = arith.constant 0 : i32
    %c0_i32_1 = arith.constant 0 : i32
    return %c0_i32, %c0_i32_0 : i32, i32
  }
  func.func @transform_7(%arg0: i32, %arg1: memref<1xi32, #tpu.memory_space<smem>>) -> (i32, i32) {
    %c0_i32 = arith.constant 0 : i32
    %c0_i32_0 = arith.constant 0 : i32
    %c0_i32_1 = arith.constant 0 : i32
    return %c0_i32, %c0_i32_0 : i32, i32
  }
}

</mosaic_0001>

<bundles_post_ra>
// kernel: _private_pipeline.1
= control target key start
LH: loop header
LB: loop body
LE: loop exit
PB: predicated region body
PF: predicated region fallthrough
CT: control target
= control target key end

     0   :  { %15 = vsyncpa [#allocation5], 0  ;;  %vm342_vm0 = vcmask 293888   ;;  %vm439_vm1 = vcmask 1041408   ;;  %v1008_v16 = vlaneseq  ;;  %v2140_v21 = vmov 1966171168   ;;  %s2659_s0 = inlined_call_operand.<no memory space> [shape: s32[1], index: 0, kind: input, shape index: {}]   ;;  %s2660_s1 = inlined_call_operand.vmem [shape: bf16[512,36], index: 1, kind: input, shape index: {}]   ;;  %s2661_s2 = inlined_call_operand.vmem [shape: bf16[3,36,128], index: 2, kind: input, shape index: {}]   ;;  %s2662_s3 = inlined_call_operand.vmem [shape: f32[3,1,128], index: 3, kind: input, shape index: {}]   ;;  %s2663_s4 = inlined_call_operand.vmem [shape: bf16[2,1024], index: 4, kind: input, shape index: {}]   ;;  %s2664_s5 = inlined_call_operand.vmem [shape: bf16[3,1024,32], index: 5, kind: input, shape index: {}]   ;;  %s2665_s6 = inlined_call_operand.vmem [shape: f32[3,1,32], index: 6, kind: input, shape index: {}]   ;;  %s2666_s7 = inlined_call_operand.hbm [shape: f32[128,128], index: 7, kind: output, shape index: {0}]   ;;  %s2667_s8 = inlined_call_operand.hbm [shape: f32[2,32], index: 8, kind: output, shape index: {1}]  }
   0x1   :  { %p74_p0 = scmp.lt.s32.totalorder %s2659_s0, 2  ;;  %v2001_v0 = vld [vmem:[%s2660_s1] sm:$0xff]   ;;  %v2003_v12 = vld [vmem:[%s2660_s1 + $0x8] sm:$0xff]   ;;  %v2007_v13 = vld [vmem:[%s2660_s1 + $0x10] sm:$0xff]   ;;  %v1006_v22 = vunpack.c.l.s4 %v2140_v21 }
   0x2   :  { %1921 = vmatprep.mubr.msk.bf16.mxu0 %vm342_vm0, %v2001_v0  ;;  %v2009_v19 = vld [vmem:[%s2660_s1 + $0x18] sm:$0xff]   ;;  %v2013_v20 = vld [vmem:[%s2660_s1 + $0x20] sm:$0xff]   ;;  %v1009_v23 = vshrl.u32 %v1008_v16, 7  ;;  %v2015_v32 = vld [vmem:[%s2660_s1 + $0x28] sm:$0xff]  }
   0x3   :  { %s2682_s0 = smov (!%p74_p0, %s2659_s0), 2  ;;  %v1007_v26 = vunpack.c.0.s8 %v1006_v22  ;;  %v2242_v27 = vld [vmem:[%s2663_s4] sm:$0xff]  ;;  %v2020_v36 = vld [vmem:[%s2660_s1 + $0x30] sm:$0xff]   ;;  %v2022_v42 = vld [vmem:[%s2660_s1 + $0x38] sm:$0xff]  }
   0x4   :  { %s1791_s11 = sshll.u32 %s2682_s0, 9  ;;  %s1986_s12 = smul.u32 20, %s2682_s0  ;;  %v2026_v44 = vld [vmem:[%s2660_s1 + $0x40] sm:$0xff]   ;;  %v2028_v48 = vld [vmem:[%s2660_s1 + $0x48] sm:$0xff]   ;;  %v2032_v50 = vld [vmem:[%s2660_s1 + $0x50] sm:$0xff]   ;;  %v1004_v56 = vcombine.high %v2242_v27, %v2242_v27 }
   0x5   :  { %s2207_s15 = scalar_lea.vmem %s2664_s5, %s1791_s11  ;;  %v2244_v28 = vsub.s32 %v1007_v26, %v1009_v23  ;;  %v2034_v54 = vld [vmem:[%s2660_s1 + $0x58] sm:$0xff]   ;;  %v2038_v57 = vld [vmem:[%s2660_s1 + $0x60] sm:$0xff]   ;;  %v2040_v62 = vld [vmem:[%s2660_s1 + $0x68] sm:$0xff]  }
   0x6   :  { %v1992_v1 = vld [vmem:[%s2207_s15 + $0x40] sm:$0xff]   ;;  %s78_s18 = scalar_lea.vmem %s2661_s2, %s1986_s12  ;;  %v1995_v4 = vld [vmem:[%s2207_s15 + $0x48] sm:$0xff]   ;;  %v1998_v7 = vld [vmem:[%s2207_s15 + $0x50] sm:$0xff]  }
   0x7   :  { %v1993_v2 = vld [vmem:[%s78_s18] sm:$0xff]   ;;  %1827 = vmatprep.subr.bf16.mxu1 %v1992_v1  ;;  %v1996_v5 = vld [vmem:[%s78_s18 + $0x8] sm:$0xff]   ;;  %v1999_v8 = vld [vmem:[%s78_s18 + $0x10] ss:$0 sps:$4 sm:$0x33]   ;;  %v1011_v30 = vrot.slane %v2242_v27, %v2244_v28  ;;  %v2307_v60 = vrot.slane %v1004_v56, %v2244_v28 }
   0x8   :  { %v1994_v3 = vld [vmem:[%s2207_s15] sm:$0xff]   ;;  %1915 = vmatprep.subr.bf16.mxu0 %v1993_v2  ;;  %v1997_v6 = vld [vmem:[%s2207_s15 + $0x8] sm:$0xff]   ;;  %v2000_v9 = vld [vmem:[%s2207_s15 + $0x10] sm:$0xff]   ;;  %v441_v10 = vsel %vm439_vm1, %v1999_v8, 0 }
   0x9   :  { %1828 = vmatpush3.bf16.msra.mxu1 %v1994_v3  ;;  %1916 = vmatpush3.bf16.msra.mxu0 %v1993_v2  ;;  %v2002_v11 = vld [vmem:[%s2207_s15 + $0x58] sm:$0xff]   ;;  %v2005_v15 = vld [vmem:[%s2207_s15 + $0x60] sm:$0xff]   ;;  %v2008_v18 = vld [vmem:[%s2207_s15 + $0x68] sm:$0xff]   ;;  %v1019_v33 = vcombine.high %v1011_v30, %v1011_v30  ;;  %v2263_v38 = vrot.slane %v1011_v30, %v2244_v28  ;;  %v1020_v1 = vcombine.high %v2307_v60, %v2307_v60 }
   0xa   :  { %1829 = vmatprep.subr.bf16.mxu1 %v1995_v4  ;;  %1917 = vmatprep.subr.bf16.mxu0 %v1996_v5  ;;  %v2004_v14 = vld [vmem:[%s2207_s15 + $0x18] sm:$0xff]   ;;  %v2006_v17 = vld [vmem:[%s2207_s15 + $0x20] sm:$0xff]   ;;  %v2010_v24 = vld [vmem:[%s2207_s15 + $0x28] sm:$0xff]  }
   0xb   :  { %v2011_v25 = vld [vmem:[%s2207_s15 + $0x70] sm:$0xff]   ;;  %v2014_v31 = vld [vmem:[%s2207_s15 + $0x78] sm:$0xff]   ;;  %v1041_v35 = vrot.slane %v1019_v33, %v2244_v28  ;;  %v2018_v37 = vld [vmem:[%s2207_s15 + $0xc0] sm:$0xff]   ;;  %v1049_v3 = vcombine.high %v2263_v38, %v2263_v38 }
   0xc   :  { %v2012_v29 = vld [vmem:[%s2207_s15 + $0x30] sm:$0xff]   ;;  %v2016_v34 = vld [vmem:[%s2207_s15 + $0x38] sm:$0xff]   ;;  %v2019_v40 = vld [vmem:[%s2207_s15 + $0x80] sm:$0xff]  }
   0xd   :  { %1830 = vmatpush3.bf16.msra.mxu1 %v1997_v6  ;;  %1918 = vmatpush3.bf16.msra.mxu0 %v1996_v5  ;;  %v1051_v39 = vcombine.high %v1041_v35, %v1041_v35  ;;  %v2021_v41 = vld [vmem:[%s2207_s15 + $0xc8] sm:$0xff]   ;;  %v2024_v45 = vld [vmem:[%s2207_s15 + $0xd0] sm:$0xff]   ;;  %v2027_v47 = vld [vmem:[%s2207_s15 + $0xd8] sm:$0xff]   ;;  %v1048_v5 = vrot.slane %v1020_v1, %v2244_v28 }
   0xe   :  { %1831 = vmatprep.subr.bf16.mxu1 %v1998_v7  ;;  %1985 = vmatprep.subr.msk.bf16.mxu0 %vm439_vm1, %v1999_v8  ;;  %v2023_v43 = vld [vmem:[%s2207_s15 + $0x88] sm:$0xff]   ;;  %v2025_v46 = vld [vmem:[%s2207_s15 + $0x90] sm:$0xff]   ;;  %v2029_v49 = vld [vmem:[%s2207_s15 + $0x98] sm:$0xff]  }
   0xf   :  { %1477 = vmatprep.mubr.bf16.mxu1 %v1041_v35  ;;  %v2030_v51 = vld [vmem:[%s2207_s15 + $0xe0] sm:$0xff]   ;;  %v2033_v53 = vld [vmem:[%s2207_s15 + $0xe8] sm:$0xff]   ;;  %v2036_v58 = vld [vmem:[%s2207_s15 + $0xf0] sm:$0xff]  }
  0x10   :  { %v2031_v52 = vld [vmem:[%s2207_s15 + $0xa0] sm:$0xff]   ;;  %v2035_v55 = vld [vmem:[%s2207_s15 + $0xa8] sm:$0xff]   ;;  %v2037_v59 = vld [vmem:[%s2207_s15 + $0xb0] sm:$0xff]  }
  0x11   :  { %1832 = vmatpush3.bf16.msra.mxu1 %v2000_v9  ;;  %1920 = vmatpush3.bf16.msra.mxu0 %v441_v10  ;;  %v2039_v61 = vld [vmem:[%s2207_s15 + $0xf8] sm:$0xff]   ;;  %v2044_v0 = vld [vmem:[%s2660_s1 + $0x70] sm:$0xff]   ;;  %v2042_v2 = vld [vmem:[%s2207_s15 + $0x140] sm:$0xff]  }
  0x12   :  { %1833 = vmatprep.subr.bf16.mxu1 %v2002_v11  ;;  %v2041_v63 = vld [vmem:[%s2207_s15 + $0xb8] sm:$0xff]   ;;  %v2043_v4 = vld [vmem:[%s2207_s15 + $0x100] sm:$0xff]   ;;  %v2045_v6 = vld [vmem:[%s2207_s15 + $0x148] sm:$0xff]  }
  0x13   :  { %v2046_v7 = vld [vmem:[%s2660_s1 + $0x78] sm:$0xff]   ;;  %v2047_v8 = vld [vmem:[%s2207_s15 + $0x108] sm:$0xff]   ;;  %v2050_v9 = vld [vmem:[%s2660_s1 + $0x80] sm:$0xff]  }
  0x14   :  { %1922 = vmatmul.mubr.msk.bf16.vlgmr.msra.gmra.mrb[0].mxu0 %vm342_vm0, %v2003_v12  ;;  %v2048_v10 = vld [vmem:[%s2207_s15 + $0x150] sm:$0xff]   ;;  %v2051_v12 = vld [vmem:[%s2207_s15 + $0x158] sm:$0xff]   ;;  %v2054_v16 = vld [vmem:[%s2207_s15 + $0x160] sm:$0xff]  }
  0x15   :  { %1834 = vmatpush3.bf16.msra.mxu1 %v2004_v14  ;;  %1925 = vmatprep.mubr.msk.bf16.mxu0 %vm342_vm0, %v2007_v13  ;;  %v2049_v11 = vld [vmem:[%s2207_s15 + $0x110] sm:$0xff]   ;;  %v2052_v13 = vld [vmem:[%s2660_s1 + $0x88] sm:$0xff]   ;;  %v2053_v14 = vld [vmem:[%s2207_s15 + $0x118] sm:$0xff]  }
  0x16   :  { %1835 = vmatprep.subr.bf16.mxu1 %v2005_v15  ;;  %v2056_v15 = vld [vmem:[%s2660_s1 + $0x90] sm:$0xff]   ;;  %v2062_v21 = vld [vmem:[%s2660_s1 + $0xa0] sm:$0xff]   ;;  %v2065_v26 = vld [vmem:[%s2207_s15 + $0x138] sm:$0xff]  }
  0x17   :  { %v2060_v22 = vld [vmem:[%s2207_s15 + $0x170] sm:$0xff]  }
  0x18   :  { %v2061_v23 = vld [vmem:[%s2207_s15 + $0x130] sm:$0xff]  }
  0x19   :  { %1836 = vmatpush3.bf16.msra.mxu1 %v2006_v17  ;;  %v2055_v17 = vld [vmem:[%s2207_s15 + $0x120] sm:$0xff]   ;;  %v2068_v27 = vld [vmem:[%s2660_s1 + $0xb0] sm:$0xff]  }
  0x1a   :  { %1837 = vmatprep.subr.bf16.mxu1 %v2008_v18  ;;  %v2057_v18 = vld [vmem:[%s2207_s15 + $0x168] sm:$0xff]  }
  0x1c   :  { %1926 = vmatmul.mubr.msk.bf16.gmra.mrb[4].mxu0 %vm342_vm0, %v2009_v19  ;;  %v2058_v19 = vld [vmem:[%s2660_s1 + $0x98] sm:$0xff]  }
  0x1d   :  { %1838 = vmatpush3.bf16.msra.mxu1 %v2010_v24  ;;  %1929 = vmatprep.mubr.msk.bf16.mxu0 %vm342_vm0, %v2013_v20  ;;  %v2059_v20 = vld [vmem:[%s2207_s15 + $0x128] sm:$0xff]   ;;  %v2063_v24 = vld [vmem:[%s2207_s15 + $0x178] sm:$0xff]  }
  0x1e   :  { %1839 = vmatprep.subr.bf16.mxu1 %v2011_v25  ;;  %v2064_v25 = vld [vmem:[%s2660_s1 + $0xa8] sm:$0xff]  }
  0x21   :  { %1840 = vmatpush3.bf16.msra.mxu1 %v2012_v29  ;;  %v2066_v29 = vld [vmem:[%s2207_s15 + $0x1c0] sm:$0xff]  }
  0x22   :  { %1841 = vmatprep.subr.bf16.mxu1 %v2014_v31 }
  0x24   :  { %1930 = vmatmul.mubr.msk.bf16.gmra.mrb[8].mxu0 %vm342_vm0, %v2015_v32 }
  0x25   :  { %1842 = vmatpush3.bf16.msra.mxu1 %v2016_v34  ;;  %1933 = vmatprep.mubr.msk.bf16.mxu0 %vm342_vm0, %v2020_v36 }
  0x26   :  { %1849 = vmatprep.subr.bf16.mxu1 %v2018_v37 }
  0x28   :  { %1478 = vmatmul.mubr.bf16.vlgmr.msra.gmra.mrb[0].mxu1 %v2263_v38 }
  0x29   :  { %1850 = vmatpush3.bf16.msra.mxu1 %v2019_v40  ;;  %1517 = vmatprep.mubr.bf16.mxu1 %v1051_v39 }
  0x2a   :  { %1851 = vmatprep.subr.bf16.mxu1 %v2021_v41 }
  0x2c   :  { %1934 = vmatmul.mubr.msk.bf16.gmra.mrb[12].mxu0 %vm342_vm0, %v2022_v42 }
  0x2d   :  { %1852 = vmatpush3.bf16.msra.mxu1 %v2023_v43  ;;  %1937 = vmatprep.mubr.msk.bf16.mxu0 %vm342_vm0, %v2026_v44 }
  0x2e   :  { %1853 = vmatprep.subr.bf16.mxu1 %v2024_v45 }
  0x31   :  { %1854 = vmatpush3.bf16.msra.mxu1 %v2025_v46 }
  0x32   :  { %1855 = vmatprep.subr.bf16.mxu1 %v2027_v47 }
  0x34   :  { %1938 = vmatmul.mubr.msk.bf16.gmra.mrb[16].mxu0 %vm342_vm0, %v2028_v48 }
  0x35   :  { %1856 = vmatpush3.bf16.msra.mxu1 %v2029_v49  ;;  %1941 = vmatprep.mubr.msk.bf16.mxu0 %vm342_vm0, %v2032_v50 }
  0x36   :  { %1857 = vmatprep.subr.bf16.mxu1 %v2030_v51 }
  0x39   :  { %1858 = vmatpush3.bf16.msra.mxu1 %v2031_v52 }
  0x3a   :  { %1859 = vmatprep.subr.bf16.mxu1 %v2033_v53 }
  0x3c   :  { %1942 = vmatmul.mubr.msk.bf16.gmra.mrb[20].mxu0 %vm342_vm0, %v2034_v54 }
  0x3d   :  { %1860 = vmatpush3.bf16.msra.mxu1 %v2035_v55  ;;  %1945 = vmatprep.mubr.msk.bf16.mxu0 %vm342_vm0, %v2038_v57 }
  0x3e   :  { %1861 = vmatprep.subr.bf16.mxu1 %v2036_v58 }
  0x41   :  { %1862 = vmatpush3.bf16.msra.mxu1 %v2037_v59 }
  0x42   :  { %1863 = vmatprep.subr.bf16.mxu1 %v2039_v61 }
  0x44   :  { %1946 = vmatmul.mubr.msk.bf16.gmra.mrb[24].mxu0 %vm342_vm0, %v2040_v62 }
  0x45   :  { %1864 = vmatpush3.bf16.msra.mxu1 %v2041_v63  ;;  %1949 = vmatprep.mubr.msk.bf16.mxu0 %vm342_vm0, %v2044_v0 }
  0x46   :  { %1871 = vmatprep.subr.bf16.mxu1 %v2042_v2 }
  0x48   :  { %1518 = vmatmul.mubr.bf16.vlgmr.msra.gmra.mrb[4].mxu1 %v1049_v3 }
  0x49   :  { %1872 = vmatpush3.bf16.msra.mxu1 %v2043_v4  ;;  %1557 = vmatprep.mubr.bf16.mxu1 %v1048_v5 }
  0x4a   :  { %1873 = vmatprep.subr.bf16.mxu1 %v2045_v6 }
  0x4c   :  { %1950 = vmatmul.mubr.msk.bf16.gmra.mrb[28].mxu0 %vm342_vm0, %v2046_v7 }
  0x4d   :  { %1874 = vmatpush3.bf16.msra.mxu1 %v2047_v8  ;;  %1953 = vmatprep.mubr.msk.bf16.mxu0 %vm342_vm0, %v2050_v9 }
  0x4e   :  { %1875 = vmatprep.subr.bf16.mxu1 %v2048_v10 }
  0x51   :  { %1876 = vmatpush3.bf16.msra.mxu1 %v2049_v11 }
  0x52   :  { %1877 = vmatprep.subr.bf16.mxu1 %v2051_v12 }
  0x54   :  { %1954 = vmatmul.mubr.msk.bf16.gmra.mrb[32].mxu0 %vm342_vm0, %v2052_v13 }
  0x55   :  { %1878 = vmatpush3.bf16.msra.mxu1 %v2053_v14  ;;  %1957 = vmatprep.mubr.msk.bf16.mxu0 %vm342_vm0, %v2056_v15 }
  0x56   :  { %1879 = vmatprep.subr.bf16.mxu1 %v2054_v16 }
  0x59   :  { %1880 = vmatpush3.bf16.msra.mxu1 %v2055_v17 }
  0x5a   :  { %1881 = vmatprep.subr.bf16.mxu1 %v2057_v18 }
  0x5c   :  { %1958 = vmatmul.mubr.msk.bf16.gmra.mrb[36].mxu0 %vm342_vm0, %v2058_v19 }
  0x5d   :  { %1882 = vmatpush3.bf16.msra.mxu1 %v2059_v20  ;;  %1961 = vmatprep.mubr.msk.bf16.mxu0 %vm342_vm0, %v2062_v21 }
  0x5e   :  { %1883 = vmatprep.subr.bf16.mxu1 %v2060_v22 }
  0x61   :  { %1884 = vmatpush3.bf16.msra.mxu1 %v2061_v23 }
  0x62   :  { %1885 = vmatprep.subr.bf16.mxu1 %v2063_v24 }
  0x63   :  { %16 = vsyncpa [#allocation7], 0  ;;  %v1034_v30 = vrot.slane %v2307_v60, %v2244_v28  ;;  %v2067_v31 = vld [vmem:[%s2207_s15 + $0x180] sm:$0xff]   ;;  %v1052_v32 = vcombine.high %v1048_v5, %v1048_v5  ;;  %v2069_v33 = vld [vmem:[%s2207_s15 + $0x1c8] sm:$0xff]   ;;  %s95_s10 = scalar_lea.vmem %s2665_s6, %s2682_s0  ;;  %s83_s12 = scalar_lea.vmem %s2662_s3, %s2682_s0  ;;  %vm1605_vm11 = vcmask 254976  }
  0x64   :  { %1962 = vmatmul.mubr.msk.bf16.gmra.mrb[40].mxu0 %vm342_vm0, %v2064_v25  ;;  %v2070_v34 = vld [vmem:[%s2660_s1 + $0xb8] sm:$0xff]   ;;  %v2071_v35 = vld [vmem:[%s2207_s15 + $0x188] sm:$0xff]   ;;  %v2074_v28 = vld [vmem:[%s2660_s1 + $0xc0] sm:$0xff]   ;;  %s2141_s0 = smov [#allocation6]  }
  0x65   :  { %1886 = vmatpush3.bf16.msra.mxu1 %v2065_v26  ;;  %1965 = vmatprep.mubr.msk.bf16.mxu0 %vm342_vm0, %v2068_v27  ;;  %v2072_v36 = vld [vmem:[%s2207_s15 + $0x1d0] sm:$0xff]   ;;  %v2075_v38 = vld [vmem:[%s2207_s15 + $0x1d8] sm:$0xff]   ;;  %v2076_v39 = vld [vmem:[%s2660_s1 + $0xc8] sm:$0xff]   ;;  %v1050_v54 = vcombine.high %v1034_v30, %v1034_v30  ;;  %s1625_s3 = sshll.u32 %s2141_s0, 4  ;;  %s2606_s3 = int_to_ptr.vmem [resolvable:$true] %s1625_s3 }
  0x66   :  { %1893 = vmatprep.subr.bf16.mxu1 %v2066_v29  ;;  %v2073_v37 = vld [vmem:[%s2207_s15 + $0x190] sm:$0xff]   ;;  %v2077_v40 = vld [vmem:[%s2207_s15 + $0x198] sm:$0xff]   ;;  %v2078_v42 = vld [vmem:[%s2207_s15 + $0x1e0] sm:$0xff]   ;;  %s2092_s13 = scalar_lea.vmem %s2606_s3, 32  ;;  %p2097_p2 = scmp.lt.s32.totalorder %s2606_s3, %s2606_s3 }
  0x67   :  { %v2080_v41 = vld [vmem:[%s2660_s1 + $0xd0] sm:$0xff]   ;;  %v2079_v43 = vld [vmem:[%s2207_s15 + $0x1a0] sm:$0xff]   ;;  %v2081_v44 = vld [vmem:[%s2207_s15 + $0x1e8] sm:$0xff]   ;;  %p2093_p1 = scmp.ne.s32.totalorder %s2606_s3, %s2092_s13  ;;  %p2098_p3 = scmp.lt.s32.totalorder %s2092_s13, %s2092_s13 }
  0x68   :  { %1558 = vmatmul.mubr.bf16.vlgmr.msra.gmra.mrb[8].mxu1 %v1034_v30  ;;  %v2082_v45 = vld [vmem:[%s2660_s1 + $0xd8] sm:$0xff]   ;;  %v2083_v46 = vld [vmem:[%s2207_s15 + $0x1a8] sm:$0xff]   ;;  %v2086_v47 = vld [vmem:[%s2660_s1 + $0xe0] sm:$0xff]  }
  0x69   :  { %1894 = vmatpush3.bf16.msra.mxu1 %v2067_v31  ;;  %1597 = vmatprep.mubr.bf16.mxu1 %v1052_v32  ;;  %v2084_v48 = vld [vmem:[%s2207_s15 + $0x1f0] sm:$0xff]   ;;  %v2087_v50 = vld [vmem:[%s2207_s15 + $0x1f8] sm:$0xff]   ;;  %v2088_v51 = vld [vmem:[%s2660_s1 + $0xe8] sm:$0xff]   ;;  %p2099_p4 = por %p2098_p3, %p2097_p2 }
  0x6a   :  { %1895 = vmatprep.subr.bf16.mxu1 %v2069_v33  ;;  %v2085_v49 = vld [vmem:[%s2207_s15 + $0x1b0] sm:$0xff]   ;;  %v2089_v52 = vld [vmem:[%s2207_s15 + $0x1b8] sm:$0xff]  }
  0x6b   :  { %v2090_v53 = vld [vmem:[%s2660_s1 + $0xf0] sm:$0xff]   ;;  %v2091_v55 = vld [vmem:[%s2660_s1 + $0xf8] sm:$0xff]   ;;  %p2100_p5 = pnand %p2099_p4, %p2093_p1 }
  0x6c   :  { %1966 = vmatmul.mubr.msk.bf16.gmra.mrb[44].mxu0 %vm342_vm0, %v2070_v34 }
  0x6d   :  { %1896 = vmatpush3.bf16.msra.mxu1 %v2071_v35  ;;  %1969 = vmatprep.mubr.msk.bf16.mxu0 %vm342_vm0, %v2074_v28  ;;  %v1726_v35 = vld [vmem:[%s95_s10] ss:$0 sm:$0xff] }
  0x6e   :  { %1897 = vmatprep.subr.bf16.mxu1 %v2072_v36 }
  0x71   :  { %1898 = vmatpush3.bf16.msra.mxu1 %v2073_v37 }
  0x72   :  { %1899 = vmatprep.subr.bf16.mxu1 %v2075_v38 }
  0x74   :  { %1970 = vmatmul.mubr.msk.bf16.gmra.mrb[48].mxu0 %vm342_vm0, %v2076_v39 }
  0x75   :  { %1900 = vmatpush3.bf16.msra.mxu1 %v2077_v40  ;;  %1973 = vmatprep.mubr.msk.bf16.mxu0 %vm342_vm0, %v2080_v41 }
  0x76   :  { %1901 = vmatprep.subr.bf16.mxu1 %v2078_v42 }
  0x79   :  { %1902 = vmatpush3.bf16.msra.mxu1 %v2079_v43 }
  0x7a   :  { %1903 = vmatprep.subr.bf16.mxu1 %v2081_v44 }
  0x7c   :  { %1974 = vmatmul.mubr.msk.bf16.gmra.mrb[52].mxu0 %vm342_vm0, %v2082_v45 }
  0x7d   :  { %1904 = vmatpush3.bf16.msra.mxu1 %v2083_v46  ;;  %1977 = vmatprep.mubr.msk.bf16.mxu0 %vm342_vm0, %v2086_v47 }
  0x7e   :  { %1905 = vmatprep.subr.bf16.mxu1 %v2084_v48 }
  0x81   :  { %1906 = vmatpush3.bf16.msra.mxu1 %v2085_v49 }
  0x82   :  { %1907 = vmatprep.subr.bf16.mxu1 %v2087_v50 }
  0x84   :  { %1978 = vmatmul.mubr.msk.bf16.gmra.mrb[56].mxu0 %vm342_vm0, %v2088_v51 }
  0x85   :  { %1908 = vmatpush3.bf16.msra.mxu1 %v2089_v52  ;;  %1981 = vmatprep.mubr.msk.bf16.mxu0 %vm342_vm0, %v2090_v53 }
  0x88   :  { %1598 = vmatmul.mubr.bf16.vlgmr.msra.gmra.mrb[12].mxu1 %v1050_v54 }
  0x8c   :  { %1982 = vmatmul.mubr.msk.bf16.gmra.mrb[60].mxu0 %vm342_vm0, %v2091_v55 }
  0xe7   :  { %v2426_v56 = vpop.f32.mrb[0].mxu0 }
  0xe8   :  { %v2428_v57 = vpop.f32.mrb[1].mxu0 }
  0xe9   :  { %v2430_v58 = vpop.f32.mrb[2].mxu0 }
  0xea   :  { %v2432_v59 = vpop.f32.mrb[3].mxu0 }
  0xef   :  { %v2434_v60 = vpop.f32.mrb[4].mxu0 }
  0xf0   :  { %v2436_v61 = vpop.f32.mrb[5].mxu0 }
  0xf1   :  { %v2438_v62 = vpop.f32.mrb[6].mxu0 }
  0xf2   :  { %v2440_v63 = vpop.f32.mrb[7].mxu0 }
  0xf7   :  { %v2442_v0 = vpop.f32.mrb[8].mxu0 }
  0xf8   :  { %v2444_v1 = vpop.f32.mrb[9].mxu0 }
  0xf9   :  { %v2446_v2 = vpop.f32.mrb[10].mxu0 }
  0xfa   :  { %v2448_v3 = vpop.f32.mrb[11].mxu0 }
  0xfb   :  { %v1843_v4 = vpop.f32.mrb[0].mxu1 }
  0xfc   :  { %v1844_v5 = vpop.f32.mrb[1].mxu1 }
  0xfd   :  { %v1845_v6 = vadd.f32 %v1844_v5, %v1843_v4  ;;  %v1846_v7 = vpop.f32.mrb[2].mxu1 }
  0xfe   :  { %v1847_v8 = vpop.f32.mrb[3].mxu1 }
  0xff   :  { %v2450_v9 = vpop.f32.mrb[12].mxu0  ;;  %v1480_v40 = vadd.f32 %v1845_v6, %v1726_v35 }
 0x100   :  { %v2452_v10 = vpop.f32.mrb[13].mxu0 }
 0x101   :  { %v2454_v11 = vpop.f32.mrb[14].mxu0 }
 0x102   :  { %v2456_v12 = vpop.f32.mrb[15].mxu0 }
 0x107   :  { %v2458_v13 = vpop.f32.mrb[16].mxu0 }
 0x108   :  { %v734_v14 = vmax.f32 %v2426_v56, %v2458_v13  ;;  %v2462_v15 = vpop.f32.mrb[17].mxu0 }
 0x109   :  { %v732_v16 = vmax.f32 %v2428_v57, %v2462_v15  ;;  %v2466_v17 = vpop.f32.mrb[18].mxu0 }
 0x10a   :  { %v735_v18 = vmax.f32 %v2430_v58, %v2466_v17  ;;  %v2470_v19 = vpop.f32.mrb[19].mxu0 }
 0x10f   :  { %v2474_v21 = vpop.f32.mrb[20].mxu0 }
 0x110   :  { %v2478_v23 = vpop.f32.mrb[21].mxu0 }
 0x111   :  { %v2482_v25 = vpop.f32.mrb[22].mxu0 }
 0x112   :  { %v2486_v27 = vpop.f32.mrb[23].mxu0 }
 0x117   :  { %v2494_v30 = vpop.f32.mrb[24].mxu0 }
 0x118   :  { %v2498_v32 = vpop.f32.mrb[25].mxu0 }
 0x119   :  { %v2502_v34 = vpop.f32.mrb[26].mxu0 }
 0x11a   :  { %v2506_v36 = vpop.f32.mrb[27].mxu0 }
 0x11b   :  { %v1865_v38 = vpop.f32.mrb[4].mxu1 }
 0x11c   :  { %v1866_v39 = vpop.f32.mrb[5].mxu1 }
 0x11d   :  { %v1867_v41 = vadd.f32 %v1866_v39, %v1865_v38  ;;  %v1868_v42 = vpop.f32.mrb[6].mxu1 }
 0x11e   :  { %v1869_v43 = vpop.f32.mrb[7].mxu1 }
 0x11f   :  { %v1520_v44 = vadd.f32 %v1867_v41, %v1480_v40  ;;  %v2510_v45 = vpop.f32.mrb[28].mxu0 }
 0x120   :  { %v2514_v47 = vpop.f32.mrb[29].mxu0 }
 0x121   :  { %v2518_v49 = vpop.f32.mrb[30].mxu0 }
 0x122   :  { %v2522_v51 = vpop.f32.mrb[31].mxu0 }
 0x127   :  { %v1955_v53 = vpop.f32.mrb[32].mxu0 }
 0x128   :  { %v605_v54 = vpop.f32.mrb[33].mxu0 }
 0x129   :  { %v1956_v55 = vpop.f32.mrb[34].mxu0 }
 0x12a   :  { %v608_v4 = vpop.f32.mrb[35].mxu0 }
 0x12f   :  { %v1959_v5 = vpop.f32.mrb[36].mxu0 }
 0x130   :  { %v621_v6 = vpop.f32.mrb[37].mxu0 }
 0x131   :  { %v1960_v7 = vpop.f32.mrb[38].mxu0 }
 0x132   :  { %v2526_v8 = vpop.f32.mrb[39].mxu0 }
 0x137   :  { %v2528_v35 = vpop.f32.mrb[40].mxu0 }
 0x138   :  { %v2530_v38 = vpop.f32.mrb[41].mxu0 }
 0x139   :  { %v2532_v39 = vpop.f32.mrb[42].mxu0 }
 0x13a   :  { %v2534_v40 = vpop.f32.mrb[43].mxu0 }
 0x13b   :  { %v1887_v41 = vpop.f32.mrb[8].mxu1 }
 0x13c   :  { %v1888_v42 = vpop.f32.mrb[9].mxu1 }
 0x13d   :  { %v1889_v43 = vadd.f32 %v1888_v42, %v1887_v41  ;;  %v1890_v52 = vpop.f32.mrb[10].mxu1  ;;  %v2550_v41 = vld [vmem:[%s83_s12] ss:$0 sm:$0xff] }
 0x13e   :  { %v1891_v50 = vpop.f32.mrb[11].mxu1 }
 0x13f   :  { %v2536_v48 = vadd.f32 %v1889_v43, %v1520_v44  ;;  %v2538_v46 = vpop.f32.mrb[44].mxu0 }
 0x140   :  { %v2540_v37 = vpop.f32.mrb[45].mxu0 }
 0x141   :  { %v2542_v28 = vpop.f32.mrb[46].mxu0 }
 0x142   :  { %v2544_v33 = vpop.f32.mrb[47].mxu0 }
 0x147   :  { %v1971_v31 = vpop.f32.mrb[48].mxu0 }
 0x148   :  { %v750_v29 = vmax.f32 %v1955_v53, %v1971_v31  ;;  %v669_v26 = vpop.f32.mrb[49].mxu0  ;;  %v2668_v53 = vmax.f32 %v2432_v59, %v2470_v19 }
 0x149   :  { %v748_v50 = vmax.f32 %v605_v54, %v669_v26  ;;  %v1972_v44 = vpop.f32.mrb[50].mxu0 }
 0x14a   :  { %v766_v52 = vmax.f32 %v734_v14, %v750_v29  ;;  %v751_v42 = vmax.f32 %v1956_v55, %v1972_v44  ;;  %v672_v43 = vpop.f32.mrb[51].mxu0  ;;  %v2669_v55 = vmax.f32 %v2434_v60, %v2474_v21  ;;  %v2672_v21 = vmax.f32 %v2440_v63, %v2486_v27 }
 0x14b   :  { %v764_v24 = vmax.f32 %v732_v16, %v748_v50  ;;  %v749_v22 = vmax.f32 %v608_v4, %v672_v43  ;;  %v2671_v43 = vmax.f32 %v2438_v62, %v2482_v25 }
 0x14c   :  { %v789_v20 = vadd.f32 %v2550_v41, %v766_v52  ;;  %v767_v31 = vmax.f32 %v735_v18, %v751_v42 }
 0x14d   :  { %v787_v26 = vadd.f32 %v2550_v41, %v764_v24  ;;  %v765_v56 = vmax.f32 %v2668_v53, %v749_v22 }
 0x14e   :  { %vm805_vm2 = vcmp.gt.f32.partialorder %v789_v20, 0.0  ;;  %v821_v13 = vmul.f32 0.001, %v789_v20  ;;  %v790_v14 = vadd.f32 %v2550_v41, %v767_v31 }
 0x14f   :  { %vm803_vm3 = vcmp.gt.f32.partialorder %v787_v26, 0.0  ;;  %v819_v57 = vmul.f32 0.001, %v787_v26  ;;  %v788_v15 = vadd.f32 %v2550_v41, %v765_v56  ;;  %v1975_v16 = vpop.f32.mrb[52].mxu0 }
 0x150   :  { %v837_v29 = vsel %vm805_vm2, %v789_v20, %v821_v13  ;;  %vm806_vm4 = vcmp.gt.f32.partialorder %v790_v14, 0.0  ;;  %v822_v54 = vmul.f32 0.001, %v790_v14  ;;  %v754_v58 = vmax.f32 %v1959_v5, %v1975_v16  ;;  %v685_v17 = vpop.f32.mrb[53].mxu0 }
 0x151   :  { %853 = vst [vmem:[#allocation4 + $0x10] sm:$0xff] %v837_v29  ;;  %v835_v18 = vsel %vm803_vm3, %v787_v26, %v819_v57  ;;  %vm804_vm5 = vcmp.gt.f32.partialorder %v788_v15, 0.0  ;;  %v820_v24 = vmul.f32 0.001, %v788_v15  ;;  %v752_v59 = vmax.f32 %v621_v6, %v685_v17  ;;  %v1976_v19 = vpop.f32.mrb[54].mxu0 }
 0x152   :  { %851 = vst [vmem:[#allocation4] sm:$0xff] %v835_v18  ;;  %v838_v22 = vsel %vm806_vm4, %v790_v14, %v822_v54  ;;  %v770_v4 = vmax.f32 %v2669_v55, %v754_v58  ;;  %v755_v50 = vmax.f32 %v1960_v7, %v1976_v19  ;;  %v688_v44 = vpop.f32.mrb[55].mxu0  ;;  %v2670_v5 = vmax.f32 %v2436_v61, %v2478_v23 }
 0x153   :  { %854 = vst [vmem:[#allocation4 + $0x18] sm:$0xff] %v838_v22  ;;  %v836_v20 = vsel %vm804_vm5, %v788_v15, %v820_v24  ;;  %v753_v42 = vmax.f32 %v2526_v8, %v688_v44  ;;  %v2673_v16 = vmax.f32 %v2442_v0, %v2494_v30  ;;  %v2675_v19 = vmax.f32 %v2446_v2, %v2502_v34 }
 0x154   :  { %v768_v52 = vmax.f32 %v2670_v5, %v752_v59  ;;  %852 = vst [vmem:[#allocation4 + $0x8] sm:$0xff] %v836_v20  ;;  %v793_v6 = vadd.f32 %v2550_v41, %v770_v4  ;;  %v771_v31 = vmax.f32 %v2671_v43, %v755_v50  ;;  %v2676_v22 = vmax.f32 %v2448_v3, %v2506_v36 }
 0x155   :  { %v769_v7 = vmax.f32 %v2672_v21, %v753_v42 }
 0x156   :  { %v791_v60 = vadd.f32 %v2550_v41, %v768_v52  ;;  %vm809_vm6 = vcmp.gt.f32.partialorder %v793_v6, 0.0  ;;  %v825_v26 = vmul.f32 0.001, %v793_v6  ;;  %v794_v61 = vadd.f32 %v2550_v41, %v771_v31 }
 0x157   :  { %v792_v8 = vadd.f32 %v2550_v41, %v769_v7  ;;  %v1979_v53 = vpop.f32.mrb[56].mxu0 }
 0x158   :  { %vm807_vm7 = vcmp.gt.f32.partialorder %v791_v60, 0.0  ;;  %v823_v23 = vmul.f32 0.001, %v791_v60  ;;  %v841_v56 = vsel %vm809_vm6, %v793_v6, %v825_v26  ;;  %vm810_vm8 = vcmp.gt.f32.partialorder %v794_v61, 0.0  ;;  %v701_v25 = vpop.f32.mrb[57].mxu0 }
 0x159   :  { %v826_v13 = vmul.f32 0.001, %v794_v61  ;;  %v758_v62 = vmax.f32 %v2528_v35, %v1979_v53  ;;  %857 = vst [vmem:[#allocation4 + $0x30] sm:$0xff] %v841_v56  ;;  %vm808_vm9 = vcmp.gt.f32.partialorder %v792_v8, 0.0  ;;  %v824_v63 = vmul.f32 0.001, %v792_v8 }
 0x15a   :  { %v839_v14 = vsel %vm807_vm7, %v791_v60, %v823_v23  ;;  %v756_v27 = vmax.f32 %v2530_v38, %v701_v25  ;;  %v1980_v57 = vpop.f32.mrb[58].mxu0  ;;  %v2674_v35 = vmax.f32 %v2444_v1, %v2498_v32  ;;  %v2677_v60 = vmax.f32 %v2450_v9, %v2510_v45 }
 0x15b   :  { %855 = vst [vmem:[#allocation4 + $0x20] sm:$0xff] %v839_v14  ;;  %v842_v15 = vsel %vm810_vm8, %v794_v61, %v826_v13  ;;  %v774_v29 = vmax.f32 %v2673_v16, %v758_v62  ;;  %v759_v54 = vmax.f32 %v2532_v39, %v1980_v57  ;;  %v704_v58 = vpop.f32.mrb[59].mxu0  ;;  %v840_v17 = vsel %vm808_vm9, %v792_v8, %v824_v63  ;;  %v1909_v59 = vpop.f32.mrb[12].mxu1 }
 0x15c   :  { %858 = vst [vmem:[#allocation4 + $0x38] sm:$0xff] %v842_v15  ;;  %v772_v18 = vmax.f32 %v2674_v35, %v756_v27  ;;  %v757_v24 = vmax.f32 %v2534_v40, %v704_v58  ;;  %856 = vst [vmem:[#allocation4 + $0x28] sm:$0xff] %v840_v17  ;;  %v1910_v30 = vpop.f32.mrb[13].mxu1 }
 0x15d   :  { %v797_v38 = vadd.f32 %v2550_v41, %v774_v29  ;;  %v775_v0 = vmax.f32 %v2675_v19, %v759_v54  ;;  %v1911_v32 = vadd.f32 %v1910_v30, %v1909_v59  ;;  %v1912_v55 = vpop.f32.mrb[14].mxu1 }
 0x15e   :  { %v795_v39 = vadd.f32 %v2550_v41, %v772_v18  ;;  %v773_v1 = vmax.f32 %v2676_v22, %v757_v24  ;;  %v1913_v50 = vpop.f32.mrb[15].mxu1 }
 0x15f   :  { %vm813_vm10 = vcmp.gt.f32.partialorder %v797_v38, 0.0  ;;  %v829_v40 = vmul.f32 0.001, %v797_v38  ;;  %v798_v4 = vadd.f32 %v2550_v41, %v775_v0  ;;  %v1600_v44 = vadd.f32 %v1911_v32, %v2536_v48  ;;  %v1983_v20 = vpop.f32.mrb[60].mxu0 }
 0x160   :  { %vm811_vm12 = vcmp.gt.f32.partialorder %v795_v39, 0.0  ;;  %v827_v2 = vmul.f32 0.001, %v795_v39  ;;  %v796_v34 = vadd.f32 %v2550_v41, %v773_v1  ;;  %v762_v36 = vmax.f32 %v2538_v46, %v1983_v20  ;;  %v717_v52 = vpop.f32.mrb[61].mxu0 }
 0x161   :  { %v845_v5 = vsel %vm813_vm10, %v797_v38, %v829_v40  ;;  %vm814_vm13 = vcmp.gt.f32.partialorder %v798_v4, 0.0  ;;  %v830_v3 = vmul.f32 0.001, %v798_v4  ;;  %v760_v43 = vmax.f32 %v2540_v37, %v717_v52  ;;  %v1984_v31 = vpop.f32.mrb[62].mxu0  ;;  %1606 = vst.msk [vmem:[#allocation6] sm:$0x3] %vm1605_vm11, %v1600_v44 }
 0x162   :  { %861 = vst [vmem:[#allocation4 + $0x50] sm:$0xff] %v845_v5  ;;  %v843_v42 = vsel %vm811_vm12, %v795_v39, %v827_v2  ;;  %vm812_vm14 = vcmp.gt.f32.partialorder %v796_v34, 0.0  ;;  %v828_v6 = vmul.f32 0.001, %v796_v34  ;;  %v778_v21 = vmax.f32 %v2677_v60, %v762_v36  ;;  %v720_v46 = vpop.f32.mrb[63].mxu0 }
 0x163   :  { %859 = vst [vmem:[#allocation4 + $0x40] sm:$0xff] %v843_v42  ;;  %v846_v48 = vsel %vm814_vm13, %v798_v4, %v830_v3  ;;  %v763_v7 = vmax.f32 %v2542_v28, %v1984_v31 }
 0x164   :  { %2103 = shalt.err (!%p2100_p5)
}
 0x165   :  { %s2104_s17 = scalar_lea.hbm %s2667_s8, 32 }
 0x166   :  { %p2105_p6 = scmp.ne.s32.totalorder %s2667_s8, %s2104_s17  ;;  %p2108_p7 = scmp.lt.u32.totalorder %s2104_s17, %s2667_s8 }
 0x168   :  { %p2110_p8 = pnand %p2108_p7, %p2105_p6 }
 0x16a   :  { %2113 = shalt.err (!%p2110_p8)
}
 0x16b   :  { %1628 = dma.vmem_to_hbm [thread:$0]  %s2606_s3, 32, %s2667_s8, [#allocation7]   ;;  %862 = vst [vmem:[#allocation4 + $0x58] sm:$0xff] %v846_v48  ;;  %v844_v9 = vsel %vm812_vm14, %v796_v34, %v828_v6  ;;  %v2678_v28 = vmax.f32 %v2452_v10, %v2514_v47  ;;  %v761_v45 = vmax.f32 %v2544_v33, %v720_v46  ;;  %v801_v26 = vadd.f32 %v2550_v41, %v778_v21 }
 0x16c   :  { %860 = vst [vmem:[#allocation4 + $0x48] sm:$0xff] %v844_v9  ;;  %v2679_v61 = vmax.f32 %v2454_v11, %v2518_v49  ;;  %v2680_v53 = vmax.f32 %v2456_v12, %v2522_v51  ;;  %s2142_s8 = smov [#allocation4]  }
 0x16d   :  { %v776_v37 = vmax.f32 %v2678_v28, %v760_v43  ;;  %vm817_vm15 = vcmp.gt.f32.partialorder %v801_v26, 0.0  ;;  %v833_v13 = vmul.f32 0.001, %v801_v26  ;;  %s1612_s22 = sshll.u32 %s2142_s8, 4  ;;  %s1613_s22 = int_to_ptr.vmem [resolvable:$true] %s1612_s22 }
 0x16e   :  { %v779_v23 = vmax.f32 %v2679_v61, %v763_v7  ;;  %v777_v56 = vmax.f32 %v2680_v53, %v761_v45  ;;  %s2114_s23 = scalar_lea.vmem %s1613_s22, 2048  ;;  %p2119_p10 = scmp.lt.s32.totalorder %s1613_s22, %s1613_s22 }
 0x16f   :  { %v799_v8 = vadd.f32 %v2550_v41, %v776_v37  ;;  %v849_v62 = vsel %vm817_vm15, %v801_v26, %v833_v13  ;;  %p2115_p9 = scmp.ne.s32.totalorder %s1613_s22, %s2114_s23  ;;  %p2120_p11 = scmp.lt.s32.totalorder %s2114_s23, %s2114_s23 }
 0x170   :  { %v802_v10 = vadd.f32 %v2550_v41, %v779_v23  ;;  %v800_v33 = vadd.f32 %v2550_v41, %v777_v56  ;;  %865 = vst [vmem:[#allocation4 + $0x70] sm:$0xff] %v849_v62 }
 0x171   :  { %vm815_vm0 = vcmp.gt.f32.partialorder %v799_v8, 0.0  ;;  %v831_v47 = vmul.f32 0.001, %v799_v8  ;;  %p2121_p12 = por %p2120_p11, %p2119_p10 }
 0x172   :  { %vm818_vm1 = vcmp.gt.f32.partialorder %v802_v10, 0.0  ;;  %v834_v11 = vmul.f32 0.001, %v802_v10  ;;  %vm816_vm2 = vcmp.gt.f32.partialorder %v800_v33, 0.0  ;;  %v832_v25 = vmul.f32 0.001, %v800_v33 }
 0x173   :  { %v847_v49 = vsel %vm815_vm0, %v799_v8, %v831_v47  ;;  %p2122_p13 = pnand %p2121_p12, %p2115_p9 }
 0x174   :  { %863 = vst [vmem:[#allocation4 + $0x60] sm:$0xff] %v847_v49  ;;  %v850_v12 = vsel %vm818_vm1, %v802_v10, %v834_v11  ;;  %v848_v51 = vsel %vm816_vm2, %v800_v33, %v832_v25 }
 0x175   :  { %866 = vst [vmem:[#allocation4 + $0x78] sm:$0xff] %v850_v12  ;;  %864 = vst [vmem:[#allocation4 + $0x68] sm:$0xff] %v848_v51 }
 0x176   :  { %2125 = shalt.err (!%p2122_p13)
}
 0x177   :  { %s2126_s26 = scalar_lea.hbm %s2666_s7, 2048 }
 0x178   :  { %p2127_p0 = scmp.ne.s32.totalorder %s2666_s7, %s2126_s26  ;;  %p2130_p1 = scmp.lt.u32.totalorder %s2126_s26, %s2666_s7 }
 0x17a   :  { %p2132_p2 = pnand %p2130_p1, %p2127_p0 }
 0x17c   :  { %2135 = shalt.err (!%p2132_p2)
}
 0x17d   :  { %s2143_s30 = smov 128   ;;  %s2144_s9 = smov 8  }
 0x17e   :  { %1618 = dma.vmem_to_hbm [thread:$0]  %s1613_s22, 2048, %s2666_s7, [#allocation5], %s2143_s30, %s2143_s30, %s2144_s9  }
 0x17f   :  { %2136 = dma.done.wait [#allocation5], 2048  }
 0x180   :  { %2137 = vsyncadd [#allocation5], 4294965248 }
 0x181   :  { %2138 = dma.done.wait [#allocation7], 32  }
 0x182   :  { %2139 = vsyncadd [#allocation7], 4294967264 }
 0x183   :  { %1635 = vsyncpa [#allocation5], 1 }
 0x184   :  { %1636 = vsyncpa [#allocation7], 1 }

</bundles_post_ra>
